<compile_context>
chip_gen: v5e
topology: v5e:2x2
jax: 0.10.0
libtpu: 0.0.40
codegen_flags: <defaults>
</compile_context>

<pallas_src>
import jax
import jax.numpy as jnp
from jax.experimental import pallas as pl
from jax.experimental.pallas import tpu as pltpu

NEURON = 64
ATT_H = 16
Y_PAD = 128   # lane-dense width of the final output slab
B_PAD = 8     # sublane-dense height of the final output slab


# ----------------------------- fused Pallas kernel -----------------------------

def make_fused_kernel(eps1, eps2, eps3):
    """Whole GinNet_Structural ('average_pool') forward in one kernel.

    eps_l are closed over as trace-time Python constants (no SMEM plumbing).
    Each GIN layer:  h = relu( (A @ h + (1+eps_l) * h) @ W_l + b_l )
    Then:            pooled = pool_mat @ h            (global_mean_pool as matmul)
                     out    = relu(pooled @ Wa1 + ba1) @ Wa2_pad + ba2_pad
    """
    def kernel(adj_ref, x_ref, w1_ref, w23_ref, bcat_ref, pool_ref,
               wa1_ref, wa2_ref, ba2_ref, out_ref):
        a = adj_ref[...].astype(jnp.float32)        # (N, N)  bf16 -> f32 (0/1 entries, exact)
        bc = bcat_ref[...]                          # (4, 128) packed biases: b1 | b2 | b3 | ba1
        h = x_ref[...]                              # (N, X_S)

        def gin_layer(h, w, b, eps):
            agg = jnp.dot(a, h, preferred_element_type=jnp.float32)     # MXU
            z = agg + (1.0 + eps) * h                                    # VPU (slack slot)
            y = jnp.dot(z, w, preferred_element_type=jnp.float32) + b    # MXU
            return jnp.maximum(y, 0.0)

        h = gin_layer(h, w1_ref[...], bc[0, :NEURON], eps1)              # (N, 64)
        h = gin_layer(h, w23_ref[0], bc[1, :NEURON], eps2)               # (N, 64)
        h = gin_layer(h, w23_ref[1], bc[2, :NEURON], eps3)               # (N, 64)

        pooled = jnp.dot(pool_ref[...], h, preferred_element_type=jnp.float32)   # (B_PAD, 64)
        a1 = jnp.maximum(
            jnp.dot(pooled, wa1_ref[...], preferred_element_type=jnp.float32) + bc[3, :ATT_H],
            0.0)                                                                  # (B_PAD, 16)
        out_ref[...] = (jnp.dot(a1, wa2_ref[...], preferred_element_type=jnp.float32)
                        + ba2_ref[...])                                           # (B_PAD, 128)
    return kernel


# ----------------------------- parameter packing --------------------------------

def pack_params(params):
    """One-time packing: stack W2/W3, pack the 4 small biases into one slab, pad attention2."""
    (w1, b1, e1), (w2, b2, e2), (w3, b3, e3) = params["gin"]
    wa1, ba1 = params["attention1"]
    wa2, ba2 = params["attention2"]
    Y = wa2.shape[1]

    w23 = jnp.stack([w2, w3])                                        # (2, 64, 64)

    bcat = jnp.zeros((4, 128), jnp.float32)                          # (4, 128)
    bcat = bcat.at[0, :NEURON].set(b1[0])
    bcat = bcat.at[1, :NEURON].set(b2[0])
    bcat = bcat.at[2, :NEURON].set(b3[0])
    bcat = bcat.at[3, :ATT_H].set(ba1[0])

    wa2p = jnp.zeros((ATT_H, Y_PAD), jnp.float32).at[:, :Y].set(wa2)  # lane-dense final proj
    ba2p = jnp.zeros((1, Y_PAD), jnp.float32).at[:, :Y].set(ba2)

    return dict(w1=w1, w23=w23, bcat=bcat, wa1=wa1, wa2p=wa2p, ba2p=ba2p,
                eps=(float(e1), float(e2), float(e3)), y=Y)


# ----------------------------- wrapper ------------------------------------------

def gin_net_structural_forward(x, adj, pool_mat, params):
    """Fused forward: one pallas_call for the whole network."""
    N, X_S = x.shape
    B = pool_mat.shape[0]
    packed = pack_params(params)
    eps1, eps2, eps3 = packed["eps"]
    Y = packed["y"]

    # bf16 adjacency halves the dominant HBM bytes; 0/1 entries are bf16-exact (eps is un-folded).
    adj_bf16 = adj.astype(jnp.bfloat16)

    # Pad the mean-pool matrix to >=8 rows so the final store is an unmasked (8k, 128) slab.
    bp = max(B_PAD, -(-B // 8) * 8)
    pool_pad = jnp.zeros((bp, N), jnp.float32).at[:B, :].set(pool_mat)

    full = lambda shape: pl.BlockSpec(shape, lambda: (0,) * len(shape))

    flops = 2 * (N * N * X_S + N * X_S * NEURON
                 + 2 * (N * N * NEURON + N * NEURON * NEURON)
                 + bp * N * NEURON + bp * NEURON * ATT_H + bp * ATT_H * Y_PAD)
    bytes_accessed = (2 * N * N + 4 * N * X_S + 4 * X_S * NEURON + 4 * 2 * NEURON * NEURON
                      + 4 * 4 * 128 + 4 * bp * N + 4 * NEURON * ATT_H
                      + 4 * ATT_H * Y_PAD + 4 * Y_PAD + 4 * bp * Y_PAD)

    out_padded = pl.pallas_call(
        make_fused_kernel(eps1, eps2, eps3),
        out_shape=jax.ShapeDtypeStruct((bp, Y_PAD), jnp.float32),
        in_specs=[
            full((N, N)),                  # adjacency (bf16)
            full((N, X_S)),                # node features
            full((X_S, NEURON)),           # GIN layer-1 weight
            full((2, NEURON, NEURON)),     # GIN layer-2/3 weights (stacked)
            full((4, 128)),                # b1 | b2 | b3 | ba1 (packed biases)
            full((bp, N)),                 # mean-pool matrix (sublane padded)
            full((NEURON, ATT_H)),         # attention1 weight
            full((ATT_H, Y_PAD)),          # attention2 weight (lane padded)
            full((1, Y_PAD)),              # attention2 bias  (lane padded)
        ],
        out_specs=full((bp, Y_PAD)),
        cost_estimate=pl.CostEstimate(flops=flops, transcendentals=0,
                                      bytes_accessed=bytes_accessed),
    )(adj_bf16, x, packed["w1"], packed["w23"], packed["bcat"], pool_pad,
      packed["wa1"], packed["wa2p"], packed["ba2p"])

    return out_padded[:B, :Y]


# ----------------------------- reference (pure JAX) ------------------------------

def reference_forward(x, adj, pool_mat, params):
    h = x
    for (w, b, eps) in params["gin"]:
        h = jax.nn.relu(((1.0 + eps) * h + adj @ h) @ w + b)
    pooled = pool_mat @ h
    w1, b1 = params["attention1"]
    w2, b2 = params["attention2"]
    return jax.nn.relu(pooled @ w1 + b1) @ w2 + b2


# ----------------------------- setup ---------------------------------------------

def linear_params(key, fan_in, fan_out):
    """PyTorch nn.Linear default init (U(-1/sqrt(fan_in), 1/sqrt(fan_in)))."""
    k_w, k_b = jax.random.split(key)
    bound = 1.0 / jnp.sqrt(fan_in)
    w = jax.random.uniform(k_w, (fan_in, fan_out), jnp.float32, -bound, bound)
    b = jax.random.uniform(k_b, (1, fan_out), jnp.float32, -bound, bound)
    return w, b


if __name__ == "__main__":
    key = jax.random.PRNGKey(0)
    N, X_S, B, YS = 16, 8, 2, 1   # 16 nodes, 8 input features, 2 graphs, ys=1

    # Deterministic inputs.
    keys = jax.random.split(key, 8)
    x = jax.random.normal(keys[0], (N, X_S), jnp.float32)

    # Two graphs of 8 nodes each (ring topology, both edge directions).
    batch = jnp.array([0] * 8 + [1] * 8, dtype=jnp.int32)
    src, dst = [], []
    for g in range(B):
        base = g * 8
        for i in range(8):
            s, d = base + i, base + (i + 1) % 8
            src += [s, d]
            dst += [d, s]
    edge_index = jnp.stack([jnp.array(src, jnp.int32), jnp.array(dst, jnp.int32)])

    # Dense adjacency A[dst, src] (GIN sums messages from sources at each target).
    adj = jnp.zeros((N, N), jnp.float32).at[edge_index[1], edge_index[0]].add(1.0)

    # global_mean_pool matrix: pool_mat[b, n] = 1/|graph_b| if batch[n]==b else 0.
    onehot = (batch[None, :] == jnp.arange(B)[:, None]).astype(jnp.float32)  # (B, N)
    counts = onehot.sum(axis=1, keepdims=True)
    pool_mat = onehot / counts

    # Parameters (deterministic).  eps1..3 play the role of np.random.uniform() in __init__.
    eps_vals = [0.37, 0.12, 0.81]
    w1g, b1g = linear_params(keys[1], X_S, NEURON)
    w2g, b2g = linear_params(keys[2], NEURON, NEURON)
    w3g, b3g = linear_params(keys[3], NEURON, NEURON)
    wa1, ba1 = linear_params(keys[4], NEURON, 16)
    wa2, ba2 = linear_params(keys[5], 16, YS)
    params = {
        "gin": [(w1g, b1g, eps_vals[0]), (w2g, b2g, eps_vals[1]), (w3g, b3g, eps_vals[2])],
        "attention1": (wa1, ba1),
        "attention2": (wa2, ba2),
    }

    out = gin_net_structural_forward(x, adj, pool_mat, params)
    out = jax.block_until_ready(out)

    ref = reference_forward(x, adj, pool_mat, params)
    assert out.shape == (B, YS)
    assert jnp.allclose(out, ref, atol=1e-4, rtol=1e-4), (out, ref)

    print("KERNEL_OK")
</pallas_src>

<mosaic_0001>
module attributes {stable_mosaic.version = 11 : i64} {
  func.func @kernel(%arg0: memref<16x16xbf16, #tpu.memory_space<vmem>>, %arg1: memref<16x8xf32, #tpu.memory_space<vmem>>, %arg2: memref<8x64xf32, #tpu.memory_space<vmem>>, %arg3: memref<2x64x64xf32, #tpu.memory_space<vmem>>, %arg4: memref<4x128xf32, #tpu.memory_space<vmem>>, %arg5: memref<8x16xf32, #tpu.memory_space<vmem>>, %arg6: memref<64x16xf32, #tpu.memory_space<vmem>>, %arg7: memref<16x128xf32, #tpu.memory_space<vmem>>, %arg8: memref<1x128xf32, #tpu.memory_space<vmem>>, %arg9: memref<8x128xf32, #tpu.memory_space<vmem>>) attributes {dimension_semantics = [], scalar_prefetch = 0 : i64, scratch_operands = 0 : i64, tpu.core_type = #tpu.core_type<tc>} {
    %c0 = arith.constant 0 : index
    %c0_0 = arith.constant 0 : index
    %0 = vector.load %arg0[%c0, %c0_0] : memref<16x16xbf16, #tpu.memory_space<vmem>>, vector<16x16xbf16>
    %1 = arith.extf %0 : vector<16x16xbf16> to vector<16x16xf32>
    %c0_1 = arith.constant 0 : index
    %c0_2 = arith.constant 0 : index
    %2 = vector.load %arg4[%c0_1, %c0_2] : memref<4x128xf32, #tpu.memory_space<vmem>>, vector<4x128xf32>
    %c0_3 = arith.constant 0 : index
    %c0_4 = arith.constant 0 : index
    %3 = vector.load %arg1[%c0_3, %c0_4] : memref<16x8xf32, #tpu.memory_space<vmem>>, vector<16x8xf32>
    %c0_5 = arith.constant 0 : index
    %c0_6 = arith.constant 0 : index
    %4 = vector.load %arg2[%c0_5, %c0_6] : memref<8x64xf32, #tpu.memory_space<vmem>>, vector<8x64xf32>
    %5 = vector.extract_strided_slice %2 {offsets = [0, 0], sizes = [1, 64], strides = [1, 1]} : vector<4x128xf32> to vector<1x64xf32>
    %6 = vector.shape_cast %5 : vector<1x64xf32> to vector<64xf32>
    %cst = arith.constant dense<0.000000e+00> : vector<16x8xf32>
    %7 = tpu.matmul %1, %3, %cst {dimension_numbers = #tpu.dot_dimension_numbers<[1], [0], [0], [1], [0, 0, 1, 1], [], []>} : vector<16x16xf32>, vector<16x8xf32>, vector<16x8xf32> -> vector<16x8xf32>
    %cst_7 = arith.constant 1.370000e+00 : f32
    %8 = vector.broadcast %cst_7 : f32 to vector<16x8xf32>
    %9 = arith.mulf %8, %3 : vector<16x8xf32>
    %10 = arith.addf %7, %9 : vector<16x8xf32>
    %cst_8 = arith.constant dense<0.000000e+00> : vector<16x64xf32>
    %11 = tpu.matmul %10, %4, %cst_8 {dimension_numbers = #tpu.dot_dimension_numbers<[1], [0], [0], [1], [0, 0, 1, 1], [], []>} : vector<16x8xf32>, vector<8x64xf32>, vector<16x64xf32> -> vector<16x64xf32>
    %12 = vector.shape_cast %6 : vector<64xf32> to vector<1x64xf32>
    %13 = vector.broadcast %12 : vector<1x64xf32> to vector<16x64xf32>
    %14 = arith.addf %11, %13 : vector<16x64xf32>
    %cst_9 = arith.constant 0.000000e+00 : f32
    %15 = vector.broadcast %cst_9 : f32 to vector<16x64xf32>
    %16 = arith.maximumf %14, %15 : vector<16x64xf32>
    %c0_10 = arith.constant 0 : index
    %c0_11 = arith.constant 0 : index
    %c0_12 = arith.constant 0 : index
    %17 = vector.load %arg3[%c0_10, %c0_11, %c0_12] : memref<2x64x64xf32, #tpu.memory_space<vmem>>, vector<1x64x64xf32>
    %18 = vector.shape_cast %17 : vector<1x64x64xf32> to vector<64x64xf32>
    %19 = vector.extract_strided_slice %2 {offsets = [1, 0], sizes = [1, 64], strides = [1, 1]} : vector<4x128xf32> to vector<1x64xf32>
    %20 = vector.shape_cast %19 : vector<1x64xf32> to vector<64xf32>
    %cst_13 = arith.constant dense<0.000000e+00> : vector<16x64xf32>
    %21 = tpu.matmul %1, %16, %cst_13 {dimension_numbers = #tpu.dot_dimension_numbers<[1], [0], [0], [1], [0, 0, 1, 1], [], []>} : vector<16x16xf32>, vector<16x64xf32>, vector<16x64xf32> -> vector<16x64xf32>
    %cst_14 = arith.constant 1.120000e+00 : f32
    %22 = vector.broadcast %cst_14 : f32 to vector<16x64xf32>
    %23 = arith.mulf %22, %16 : vector<16x64xf32>
    %24 = arith.addf %21, %23 : vector<16x64xf32>
    %cst_15 = arith.constant dense<0.000000e+00> : vector<16x64xf32>
    %25 = tpu.matmul %24, %18, %cst_15 {dimension_numbers = #tpu.dot_dimension_numbers<[1], [0], [0], [1], [0, 0, 1, 1], [], []>} : vector<16x64xf32>, vector<64x64xf32>, vector<16x64xf32> -> vector<16x64xf32>
    %26 = vector.shape_cast %20 : vector<64xf32> to vector<1x64xf32>
    %27 = vector.broadcast %26 : vector<1x64xf32> to vector<16x64xf32>
    %28 = arith.addf %25, %27 : vector<16x64xf32>
    %cst_16 = arith.constant 0.000000e+00 : f32
    %29 = vector.broadcast %cst_16 : f32 to vector<16x64xf32>
    %30 = arith.maximumf %28, %29 : vector<16x64xf32>
    %c1 = arith.constant 1 : index
    %c0_17 = arith.constant 0 : index
    %c0_18 = arith.constant 0 : index
    %31 = vector.load %arg3[%c1, %c0_17, %c0_18] : memref<2x64x64xf32, #tpu.memory_space<vmem>>, vector<1x64x64xf32>
    %32 = vector.shape_cast %31 : vector<1x64x64xf32> to vector<64x64xf32>
    %33 = vector.extract_strided_slice %2 {offsets = [2, 0], sizes = [1, 64], strides = [1, 1]} : vector<4x128xf32> to vector<1x64xf32>
    %34 = vector.shape_cast %33 : vector<1x64xf32> to vector<64xf32>
    %cst_19 = arith.constant dense<0.000000e+00> : vector<16x64xf32>
    %35 = tpu.matmul %1, %30, %cst_19 {dimension_numbers = #tpu.dot_dimension_numbers<[1], [0], [0], [1], [0, 0, 1, 1], [], []>} : vector<16x16xf32>, vector<16x64xf32>, vector<16x64xf32> -> vector<16x64xf32>
    %cst_20 = arith.constant 1.810000e+00 : f32
    %36 = vector.broadcast %cst_20 : f32 to vector<16x64xf32>
    %37 = arith.mulf %36, %30 : vector<16x64xf32>
    %38 = arith.addf %35, %37 : vector<16x64xf32>
    %cst_21 = arith.constant dense<0.000000e+00> : vector<16x64xf32>
    %39 = tpu.matmul %38, %32, %cst_21 {dimension_numbers = #tpu.dot_dimension_numbers<[1], [0], [0], [1], [0, 0, 1, 1], [], []>} : vector<16x64xf32>, vector<64x64xf32>, vector<16x64xf32> -> vector<16x64xf32>
    %40 = vector.shape_cast %34 : vector<64xf32> to vector<1x64xf32>
    %41 = vector.broadcast %40 : vector<1x64xf32> to vector<16x64xf32>
    %42 = arith.addf %39, %41 : vector<16x64xf32>
    %cst_22 = arith.constant 0.000000e+00 : f32
    %43 = vector.broadcast %cst_22 : f32 to vector<16x64xf32>
    %44 = arith.maximumf %42, %43 : vector<16x64xf32>
    %c0_23 = arith.constant 0 : index
    %c0_24 = arith.constant 0 : index
    %45 = vector.load %arg5[%c0_23, %c0_24] : memref<8x16xf32, #tpu.memory_space<vmem>>, vector<8x16xf32>
    %cst_25 = arith.constant dense<0.000000e+00> : vector<8x64xf32>
    %46 = tpu.matmul %45, %44, %cst_25 {dimension_numbers = #tpu.dot_dimension_numbers<[1], [0], [0], [1], [0, 0, 1, 1], [], []>} : vector<8x16xf32>, vector<16x64xf32>, vector<8x64xf32> -> vector<8x64xf32>
    %c0_26 = arith.constant 0 : index
    %c0_27 = arith.constant 0 : index
    %47 = vector.load %arg6[%c0_26, %c0_27] : memref<64x16xf32, #tpu.memory_space<vmem>>, vector<64x16xf32>
    %cst_28 = arith.constant dense<0.000000e+00> : vector<8x16xf32>
    %48 = tpu.matmul %46, %47, %cst_28 {dimension_numbers = #tpu.dot_dimension_numbers<[1], [0], [0], [1], [0, 0, 1, 1], [], []>} : vector<8x64xf32>, vector<64x16xf32>, vector<8x16xf32> -> vector<8x16xf32>
    %49 = vector.extract_strided_slice %2 {offsets = [3, 0], sizes = [1, 16], strides = [1, 1]} : vector<4x128xf32> to vector<1x16xf32>
    %50 = vector.shape_cast %49 : vector<1x16xf32> to vector<16xf32>
    %51 = vector.shape_cast %50 : vector<16xf32> to vector<1x16xf32>
    %52 = vector.broadcast %51 : vector<1x16xf32> to vector<8x16xf32>
    %53 = arith.addf %48, %52 : vector<8x16xf32>
    %cst_29 = arith.constant 0.000000e+00 : f32
    %54 = vector.broadcast %cst_29 : f32 to vector<8x16xf32>
    %55 = arith.maximumf %53, %54 : vector<8x16xf32>
    %c0_30 = arith.constant 0 : index
    %c0_31 = arith.constant 0 : index
    %56 = vector.load %arg7[%c0_30, %c0_31] : memref<16x128xf32, #tpu.memory_space<vmem>>, vector<16x128xf32>
    %cst_32 = arith.constant dense<0.000000e+00> : vector<8x128xf32>
    %57 = tpu.matmul %55, %56, %cst_32 {dimension_numbers = #tpu.dot_dimension_numbers<[1], [0], [0], [1], [0, 0, 1, 1], [], []>} : vector<8x16xf32>, vector<16x128xf32>, vector<8x128xf32> -> vector<8x128xf32>
    %c0_33 = arith.constant 0 : index
    %c0_34 = arith.constant 0 : index
    %58 = vector.load %arg8[%c0_33, %c0_34] : memref<1x128xf32, #tpu.memory_space<vmem>>, vector<1x128xf32>
    %59 = vector.broadcast %58 : vector<1x128xf32> to vector<8x128xf32>
    %60 = arith.addf %57, %59 : vector<8x128xf32>
    %c0_35 = arith.constant 0 : index
    %c0_36 = arith.constant 0 : index
    %61 = vector.load %arg9[%c0_35, %c0_36] : memref<8x128xf32, #tpu.memory_space<vmem>>, vector<8x128xf32>
    tpu.vector_store %arg9[%c0_35, %c0_36], %60 {strides = array<i32>} : memref<8x128xf32, #tpu.memory_space<vmem>>, vector<8x128xf32>,
    return
  }
}

</mosaic_0001>

<bundles_post_ra>
// kernel: tpu_custom_call.1
= control target key start
LH: loop header
LB: loop body
LE: loop exit
PB: predicated region body
PF: predicated region fallthrough
CT: control target
= control target key end

     0   :  { %14 = vsyncpa [#allocation3], 0  ;;  %s574_s0 = inlined_call_operand.vmem [shape: bf16[16,16], index: 0, kind: input, shape index: {}]   ;;  %s575_s1 = inlined_call_operand.vmem [shape: f32[16,8], index: 1, kind: input, shape index: {}]   ;;  %s576_s2 = inlined_call_operand.vmem [shape: f32[8,64], index: 2, kind: input, shape index: {}]   ;;  %s577_s3 = inlined_call_operand.hbm [shape: f32[2,64,64], index: 3, kind: input, shape index: {}]   ;;  %s578_s4 = inlined_call_operand.vmem [shape: f32[4,128], index: 4, kind: input, shape index: {}]   ;;  %s579_s5 = inlined_call_operand.vmem [shape: f32[8,16], index: 5, kind: input, shape index: {}]   ;;  %s580_s6 = inlined_call_operand.vmem [shape: f32[64,16], index: 6, kind: input, shape index: {}]   ;;  %s581_s7 = inlined_call_operand.vmem [shape: f32[16,128], index: 7, kind: input, shape index: {}]   ;;  %s582_s8 = inlined_call_operand.vmem [shape: f32[1,128], index: 8, kind: input, shape index: {}]   ;;  %s583_s9 = inlined_call_operand.hbm [shape: f32[8,128], index: 9, kind: output, shape index: {}]  }
   0x1   :  { %15 = vsyncpa [#allocation4], 0  ;;  %s26_s11 = sshll.u32 %s577_s3, 4  ;;  %s434_s12 = smov [#allocation2]   ;;  %s27_s11 = int_to_ptr.hbm [resolvable:$true] %s26_s11 }
   0x2   :  { %s28_s13 = sshll.u32 %s434_s12, 4  ;;  %s435_s14 = smov 128   ;;  %s29_s13 = int_to_ptr.vmem [resolvable:$true] %s28_s13 }
   0x3   :  { %s436_s15 = smov 8  }
   0x4   :  { %34 = dma.hbm_to_vmem [thread:$0]  %s27_s11, 2048, %s29_s13, [#allocation3], %s435_s14, %s435_s14, %s436_s15  }
   0x5   :  { %430 = dma.done.wait [#allocation3], 2048  }
   0x6   :  { %431 = vsyncadd [#allocation3], 4294965248  ;;  %v55_v0 = vld [vmem:[%s575_s1 + $0x8] sm:$0xff]  ;;  %v54_v1 = vld [vmem:[%s575_s1] sm:$0xff]  ;;  %vm59_vm0 = vcmask 130048   ;;  %vm90_vm1 = vcmask 64512  }
   0x7   :  { %v374_v2 = vld [vmem:[%s574_s0] sm:$0xff]   ;;  %80 = vmatpush.msra.mxu0 %v55_v0  ;;  %v57_v6 = vmul.f32 1.37, %v54_v1  ;;  %v58_v9 = vmul.f32 1.37, %v55_v0  ;;  %v129_v12 = vld [vmem:[#allocation2 + $0x38] sm:$0xff] }
   0x8   :  { %v500_v3 = vunpack.c.l.bf16 %v374_v2  ;;  %v504_v4 = vunpack.c.h.bf16 %v374_v2  ;;  %v56_v5 = vld [vmem:[%s576_s2] sm:$0xff]  ;;  %v128_v13 = vld [vmem:[#allocation2 + $0x30] sm:$0xff]  ;;  %171 = vmatpush.msra.mxu3 %v129_v12  ;;  %v127_v14 = vld [vmem:[#allocation2 + $0x28] sm:$0xff]  ;;  %vm156_vm2 = vcmask 523264   ;;  %s437_s3 = smov [#allocation5]   ;;  %s348_s2 = sshll.u32 %s583_s9, 4  ;;  %s349_s2 = int_to_ptr.hbm [resolvable:$true] %s348_s2 }
   0x9   :  { %81 = vmatpush.msra.mxu0 %v54_v1  ;;  %112 = vmatpush.msra.mxu1 %v56_v5  ;;  %v126_v15 = vld [vmem:[#allocation2 + $0x20] sm:$0xff]  ;;  %v125_v16 = vld [vmem:[#allocation2 + $0x18] sm:$0xff]  ;;  %v124_v18 = vld [vmem:[#allocation2 + $0x10] sm:$0xff]  ;;  %s346_s22 = sshll.u32 %s437_s3, 4  ;;  %s347_s22 = int_to_ptr.vmem [resolvable:$true] %s346_s22 }
   0xa   :  { %358 = vmatmul.msk.f32.vlgmr.msra.gmra.mxu0 %vm59_vm0, %v500_v3  ;;  %172 = vmatpush.msra.mxu3 %v128_v13  ;;  %v514_v19 = vld [vmem:[%s578_s4] sm:$0xf]  ;;  %v123_v26 = vld [vmem:[#allocation2 + $0x8] sm:$0xff]  ;;  %v196_v34 = vld [vmem:[#allocation2 + $0x78] sm:$0xff] }
   0xb   :  { %v89_v20 = vperm.slane %v514_v19, 0  ;;  %v122_v27 = vld [vmem:[#allocation2] sm:$0xff]  ;;  %v195_v35 = vld [vmem:[#allocation2 + $0x70] sm:$0xff]  ;;  %237 = vmatpush.msrb.mxu0 %v196_v34  ;;  %v194_v36 = vld [vmem:[#allocation2 + $0x68] sm:$0xff]  ;;  %v155_v41 = vperm.slane %v514_v19, 1  ;;  %v222_v0 = vperm.slane %v514_v19, 2 }
   0xc   :  { %173 = vmatpush.msra.mxu3 %v127_v14  ;;  %v193_v37 = vld [vmem:[#allocation2 + $0x60] sm:$0xff]  ;;  %v192_v38 = vld [vmem:[#allocation2 + $0x58] sm:$0xff]  ;;  %v191_v40 = vld [vmem:[#allocation2 + $0x50] sm:$0xff] }
   0xd   :  { %238 = vmatpush.msrb.mxu0 %v195_v35  ;;  %v190_v47 = vld [vmem:[#allocation2 + $0x48] sm:$0xff]  ;;  %v189_v48 = vld [vmem:[#allocation2 + $0x40] sm:$0xff]  ;;  %v285_v55 = vld [vmem:[%s580_s6 + $0x38] sm:$0xff] }
   0xe   :  { %174 = vmatpush.msra.mxu3 %v126_v15  ;;  %v284_v56 = vld [vmem:[%s580_s6 + $0x30] sm:$0xff]  ;;  %v283_v57 = vld [vmem:[%s580_s6 + $0x28] sm:$0xff]  ;;  %v282_v58 = vld [vmem:[%s580_s6 + $0x20] sm:$0xff] }
   0xf   :  { %239 = vmatpush.msrb.mxu0 %v194_v36  ;;  %v281_v59 = vld [vmem:[%s580_s6 + $0x18] sm:$0xff]  ;;  %v280_v60 = vld [vmem:[%s580_s6 + $0x10] sm:$0xff]  ;;  %v279_v61 = vld [vmem:[%s580_s6 + $0x8] sm:$0xff] }
  0x10   :  { %175 = vmatpush.msra.mxu3 %v125_v16  ;;  %v278_v62 = vld [vmem:[%s580_s6] sm:$0xff] }
  0x11   :  { %240 = vmatpush.msrb.mxu0 %v193_v37  ;;  %v381_v14 = vld [vmem:[%s582_s8] ss:$0 sm:$0xff] }
  0x12   :  { %359 = vmatmul.msk.f32.gmra.mxu0 %vm59_vm0, %v504_v4  ;;  %176 = vmatpush.msra.mxu3 %v124_v18 }
  0x13   :  { %241 = vmatpush.msrb.mxu0 %v192_v38 }
  0x14   :  { %177 = vmatpush.msra.mxu3 %v123_v26 }
  0x15   :  { %242 = vmatpush.msrb.mxu0 %v191_v40 }
  0x16   :  { %178 = vmatpush.msra.mxu3 %v122_v27 }
  0x17   :  { %243 = vmatpush.msrb.mxu0 %v190_v47 }
  0x18   :  { %298 = vmatpush.msrb.mxu3 %v285_v55 }
  0x19   :  { %244 = vmatpush.msrb.mxu0 %v189_v48 }
  0x1a   :  { %299 = vmatpush.msrb.mxu3 %v284_v56 }
  0x1c   :  { %300 = vmatpush.msrb.mxu3 %v283_v57 }
  0x1e   :  { %301 = vmatpush.msrb.mxu3 %v282_v58 }
  0x20   :  { %302 = vmatpush.msrb.mxu3 %v281_v59 }
  0x22   :  { %303 = vmatpush.msrb.mxu3 %v280_v60 }
  0x24   :  { %304 = vmatpush.msrb.mxu3 %v279_v61 }
  0x26   :  { %305 = vmatpush.msrb.mxu3 %v278_v62 }
  0x87   :  { %v83_v7 = vpop.f32.mrf.mxu0 }
  0x88   :  { %v84_v8 = vadd.f32 %v83_v7, %v57_v6  ;;  %v254_v6 = vld [vmem:[%s579_s5] sm:$0xff]  ;;  %v312_v7 = vld [vmem:[%s581_s7 + $0x8] sm:$0xff] }
  0x8a   :  { %360 = vmatmul.msk.f32.vlgmr.msra.gmra.mxu1 %vm90_vm1, %v84_v8 }
  0x8f   :  { %v86_v10 = vpop.f32.mrf.mxu0 }
  0x90   :  { %v87_v11 = vadd.f32 %v86_v10, %v58_v9  ;;  %v311_v9 = vld [vmem:[%s581_s7] sm:$0xff]  ;;  %v286_v10 = vperm.slane %v514_v19, 3 }
  0x92   :  { %361 = vmatmul.msk.f32.gmra.mxu1 %vm90_vm1, %v87_v11 }
 0x107   :  { %v114_v17 = vpop.f32.mrf.mxu1 }
 0x108   :  { %v115_v22 = vadd.f32 %v114_v17, %v89_v20 }
 0x10a   :  { %v120_v25 = vmax.f32 %v115_v22, 0.0 }
 0x10c   :  { %v130_v28 = vmul.f32 1.12, %v120_v25 }
 0x10f   :  { %v117_v21 = vpop.f32.mrf.mxu1 }
 0x110   :  { %v118_v23 = vadd.f32 %v117_v21, %v89_v20 }
 0x112   :  { %v121_v24 = vmax.f32 %v118_v23, 0.0 }
 0x114   :  { %146 = vmatpush.msra.mxu2 %v121_v24  ;;  %v131_v31 = vmul.f32 1.12, %v121_v24 }
 0x116   :  { %147 = vmatpush.msra.mxu2 %v120_v25 }
 0x117   :  { %362 = vmatmul.msk.f32.vlgmr.msra.gmra.mxu2 %vm59_vm0, %v500_v3 }
 0x11f   :  { %363 = vmatmul.msk.f32.gmra.mxu2 %vm59_vm0, %v504_v4 }
 0x19a   :  { %v149_v29 = vpop.f32.mrf.mxu2 }
 0x19b   :  { %v150_v30 = vadd.f32 %v149_v29, %v130_v28 }
 0x19d   :  { %364 = vmatmul.msk.f32.vlgmr.msra.gmra.mxu3 %vm156_vm2, %v150_v30 }
 0x1a2   :  { %v152_v32 = vpop.f32.mrf.mxu2 }
 0x1a3   :  { %v153_v33 = vadd.f32 %v152_v32, %v131_v31 }
 0x1a5   :  { %365 = vmatmul.msk.f32.gmra.mxu3 %vm156_vm2, %v153_v33 }
 0x220   :  { %v180_v39 = vpop.f32.mrf.mxu3 }
 0x221   :  { %v181_v43 = vadd.f32 %v180_v39, %v155_v41 }
 0x223   :  { %v186_v46 = vmax.f32 %v181_v43, 0.0 }
 0x225   :  { %v197_v49 = vmul.f32 1.81, %v186_v46 }
 0x228   :  { %v183_v42 = vpop.f32.mrf.mxu3 }
 0x229   :  { %v184_v44 = vadd.f32 %v183_v42, %v155_v41 }
 0x22b   :  { %v187_v45 = vmax.f32 %v184_v44, 0.0 }
 0x22d   :  { %213 = vmatpush.msrb.mxu1 %v187_v45  ;;  %v198_v52 = vmul.f32 1.81, %v187_v45 }
 0x22f   :  { %214 = vmatpush.msrb.mxu1 %v186_v46 }
 0x230   :  { %366 = vmatmul.msk.f32.vlgmr.msrb.gmra.mxu1 %vm59_vm0, %v500_v3 }
 0x238   :  { %367 = vmatmul.msk.f32.gmra.mxu1 %vm59_vm0, %v504_v4 }
 0x2ad   :  { %v216_v50 = vpop.f32.mrf.mxu1 }
 0x2ae   :  { %v217_v51 = vadd.f32 %v216_v50, %v197_v49 }
 0x2b0   :  { %368 = vmatmul.msk.f32.vlgmr.msrb.gmra.mxu0 %vm156_vm2, %v217_v51 }
 0x2b5   :  { %v219_v53 = vpop.f32.mrf.mxu1 }
 0x2b6   :  { %v220_v54 = vadd.f32 %v219_v53, %v198_v52 }
 0x2b8   :  { %369 = vmatmul.msk.f32.gmra.mxu0 %vm156_vm2, %v220_v54 }
 0x32d   :  { %v246_v63 = vpop.f32.mrf.mxu0 }
 0x32e   :  { %v247_v2 = vadd.f32 %v246_v63, %v222_v0 }
 0x330   :  { %v252_v5 = vmax.f32 %v247_v2, 0.0 }
 0x335   :  { %v249_v1 = vpop.f32.mrf.mxu0 }
 0x336   :  { %v250_v3 = vadd.f32 %v249_v1, %v222_v0 }
 0x338   :  { %v253_v4 = vmax.f32 %v250_v3, 0.0 }
 0x33a   :  { %272 = vmatpush.msrb.mxu2 %v253_v4 }
 0x33c   :  { %273 = vmatpush.msrb.mxu2 %v252_v5 }
 0x33d   :  { %370 = vmatmul.msk.f32.vlgmr.msrb.gmra.mxu2 %vm59_vm0, %v254_v6 }
 0x33e   :  { %334 = vmatpush.msra.mxu2 %v312_v7 }
 0x340   :  { %335 = vmatpush.msra.mxu2 %v311_v9 }
 0x3c0   :  { %v275_v8 = vpop.f32.mrf.mxu2 }
 0x3c1   :  { %371 = vmatmul.msk.f32.vlgmr.msrb.gmra.mxu3 %vm156_vm2, %v275_v8 }
 0x444   :  { %v307_v11 = vpop.f32.mrf.mxu3 }
 0x445   :  { %v308_v12 = vadd.f32 %v307_v11, %v286_v10 }
 0x447   :  { %v310_v13 = vmax.f32 %v308_v12, 0.0 }
 0x449   :  { %372 = vmatmul.msk.f32.vlgmr.msra.gmra.mxu2 %vm59_vm0, %v310_v13 }
 0x4cc   :  { %v337_v15 = vpop.f32.mrf.mxu2 }
 0x4cd   :  { %v338_v16 = vadd.f32 %v381_v14, %v337_v15 }
 0x4cf   :  { %340 = vst [vmem:[#allocation5] sm:$0xff] %v338_v16 }
 0x4d0   :  { %351 = dma.vmem_to_hbm [thread:$0]  %s347_s22, 128, %s349_s2, [#allocation4]  }
 0x4d1   :  { %432 = dma.done.wait [#allocation4], 128  }
 0x4d2   :  { %433 = vsyncadd [#allocation4], 4294967168 }
 0x4d3   :  { %356 = vsyncpa [#allocation3], 1 }
 0x4d4   :  { %357 = vsyncpa [#allocation4], 1 }

</bundles_post_ra>
